<compile_context>
chip_gen: v7x
topology: tpu7x:2x2x1
jax: 0.10.0
libtpu: 0.0.40
codegen_flags: <defaults>
</compile_context>

<pallas_src>
import functools

import jax
import jax.numpy as jnp
from jax.experimental import pallas as pl
from jax.experimental.pallas import tpu as pltpu


def _round_up(x, m):
    return ((x + m - 1) // m) * m


def _pad2(a, rows, cols):
    pr, pc = rows - a.shape[0], cols - a.shape[1]
    if pr or pc:
        a = jnp.pad(a, ((0, pr), (0, pc)))
    return a


def _hash_u32(x):
    """murmur3-style 32-bit finalizer; plain uint32 VPU ops (portable, no TPU-only prims)."""
    x = x ^ (x >> 16)
    x = x * jnp.uint32(0x85EBCA6B)
    x = x ^ (x >> 13)
    x = x * jnp.uint32(0xC2B2AE35)
    x = x ^ (x >> 16)
    return x


def _ffn_kernel(dropout_rate, keep_threshold, inv_keep_scale, seed_mix, d_ff_total,
                x_ref, w1_ref, b1_ref, w2_ref, b2_ref, o_ref, acc_ref):
    i = pl.program_id(0)   # row tile   (parallel)
    k = pl.program_id(1)   # d_ff tile  (reduction, innermost)

    @pl.when(k == 0)
    def _():
        acc_ref[...] = jnp.zeros_like(acc_ref)

    # ---- matmul 1 (MXU) + bias + ReLU on this d_ff slice --------------------
    h = jnp.dot(x_ref[...], w1_ref[...], preferred_element_type=jnp.float32)
    h = jnp.maximum(h + b1_ref[...], 0.0)

    # ---- inverted dropout (train mode), integer-threshold compare -----------
    if dropout_rate > 0.0:
        tm_blk, tk_blk = h.shape
        rows = jax.lax.broadcasted_iota(jnp.int32, h.shape, 0) + i * tm_blk
        cols = jax.lax.broadcasted_iota(jnp.int32, h.shape, 1) + k * tk_blk
        idx = rows * d_ff_total + cols                      # global element index
        bits = jax.lax.bitcast_convert_type(idx, jnp.uint32) + jnp.uint32(seed_mix)
        bits = _hash_u32(bits)                              # uniform uint32
        keep = bits >= jnp.uint32(keep_threshold)           # P(drop) = threshold / 2^32
        h = jnp.where(keep, h * inv_keep_scale, 0.0)

    # ---- matmul 2 (MXU): accumulate partial product into f32 scratch --------
    acc_ref[...] += jnp.dot(h.astype(w2_ref.dtype), w2_ref[...],
                            preferred_element_type=jnp.float32)

    @pl.when(k == pl.num_programs(1) - 1)
    def _():
        o_ref[...] = (acc_ref[...] + b2_ref[...]).astype(o_ref.dtype)


def feed_forward_block(x, w1, b1, w2, b2, *, dropout_rate=0.0, seed=0,
                       tm=256, tk=512, compute_dtype=None):
    """x: (B, S, d_model). w1: (d_model, d_ff), w2: (d_ff, d_model). Returns (B, S, d_model).

    compute_dtype: dtype fed to the MXU (e.g. jnp.bfloat16 on v6e/v7x); accumulation is f32.
    """
    B, S, d_model = x.shape
    d_ff = w1.shape[1]
    assert w1.shape == (d_model, d_ff) and w2.shape == (d_ff, d_model)
    assert b1.shape == (d_ff,) and b2.shape == (d_model,)

    out_dtype = x.dtype
    cdt = jnp.dtype(compute_dtype) if compute_dtype is not None else jnp.dtype(out_dtype)

    # ---- lane/sublane-dense padded geometry (no hard divisibility asserts) ----
    M = B * S
    d_model_p = _round_up(d_model, 128)
    tm = max(16, min(_round_up(tm, 16), _round_up(M, 16)))   # mult. of 16 covers f32 & bf16
    M_p = _round_up(M, tm)
    d_ff_p = _round_up(d_ff, 128)
    tk = max(128, min(_round_up(tk, 128), d_ff_p))
    d_ff_p = _round_up(d_ff_p, tk)                            # blocks divide evenly

    x2d = _pad2(x.reshape(M, d_model).astype(cdt), M_p, d_model_p)
    w1p = _pad2(w1.astype(cdt), d_model_p, d_ff_p)
    w2p = _pad2(w2.astype(cdt), d_ff_p, d_model_p)
    b1p = _pad2(b1.reshape(1, d_ff).astype(jnp.float32), 1, d_ff_p)
    b2p = _pad2(b2.reshape(1, d_model).astype(jnp.float32), 1, d_model_p)

    grid = (M_p // tm, d_ff_p // tk)

    # ---- static dropout constants (host-side) ----
    keep_threshold = min(int(round(float(dropout_rate) * 4294967296.0)), 0xFFFFFFFF)
    inv_keep = 1.0 / (1.0 - dropout_rate) if dropout_rate < 1.0 else 0.0
    seed_mix = (int(seed) * 0x9E3779B9 + 0x7F4A7C15) & 0xFFFFFFFF

    kernel = functools.partial(_ffn_kernel, float(dropout_rate), keep_threshold,
                               float(inv_keep), seed_mix, int(d_ff_p))

    # ---- VMEM budget / cost estimate ----
    isz = jnp.dtype(cdt).itemsize
    vmem_needed = (
        2 * (tm * d_model_p + d_model_p * tk + tk * d_model_p) * isz   # x, W1, W2 (dbl-buffered)
        + 2 * (tk + d_model_p) * 4                                     # b1, b2
        + 2 * tm * d_model_p * jnp.dtype(out_dtype).itemsize           # out
        + tm * d_model_p * 4)                                          # f32 accumulator
    vmem_limit = int(min(max(2 * vmem_needed, 32 << 20), 96 << 20))

    cost = pl.CostEstimate(
        flops=4 * M_p * d_model_p * d_ff_p,
        transcendentals=0,
        bytes_accessed=int((x2d.size + w1p.size + w2p.size) * isz
                           + (b1p.size + b2p.size) * 4
                           + M_p * d_model_p * jnp.dtype(out_dtype).itemsize))

    out2d = pl.pallas_call(
        kernel,
        out_shape=jax.ShapeDtypeStruct((M_p, d_model_p), out_dtype),
        grid_spec=pltpu.PrefetchScalarGridSpec(
            num_scalar_prefetch=0,
            grid=grid,
            in_specs=[
                pl.BlockSpec((tm, d_model_p), lambda i, k: (i, 0)),   # x tile (resident over k)
                pl.BlockSpec((d_model_p, tk), lambda i, k: (0, k)),   # W1 tile (streamed)
                pl.BlockSpec((1, tk),         lambda i, k: (0, k)),   # b1 tile
                pl.BlockSpec((tk, d_model_p), lambda i, k: (k, 0)),   # W2 tile (streamed)
                pl.BlockSpec((1, d_model_p),  lambda i, k: (0, 0)),   # b2
            ],
            out_specs=pl.BlockSpec((tm, d_model_p), lambda i, k: (i, 0)),
            scratch_shapes=[pltpu.VMEM((tm, d_model_p), jnp.float32)],
        ),
        compiler_params=pltpu.CompilerParams(
            dimension_semantics=("parallel", "arbitrary"),
            vmem_limit_bytes=vmem_limit),
        cost_estimate=cost,
    )(x2d, w1p, b1p, w2p, b2p)

    return out2d[:M, :d_model].reshape(B, S, d_model)


def init_linear_params(key, in_features, out_features):
    """Mimic nn.Linear default init: U(-1/sqrt(in), 1/sqrt(in)); stored as (in, out)."""
    kw, kb = jax.random.split(key)
    bound = 1.0 / (in_features ** 0.5)
    w = jax.random.uniform(kw, (in_features, out_features),
                           minval=-bound, maxval=bound, dtype=jnp.float32)
    b = jax.random.uniform(kb, (out_features,),
                           minval=-bound, maxval=bound, dtype=jnp.float32)
    return w, b


if __name__ == "__main__":
    # Small shapes; deliberately not multiples of 128 to exercise the padding path,
    # and d_ff > 128 so the d_ff reduction axis runs multiple k steps with tk=128.
    d_model, d_ff = 32, 320
    B, S = 2, 8

    key = jax.random.PRNGKey(0)
    kx, k1, k2 = jax.random.split(key, 3)
    x = jax.random.normal(kx, (B, S, d_model), dtype=jnp.float32)
    w1, b1 = init_linear_params(k1, d_model, d_ff)
    w2, b2 = init_linear_params(k2, d_ff, d_model)

    ref = jnp.maximum(x @ w1 + b1, 0.0) @ w2 + b2

    # 1) eval-mode (dropout identity), f32 compute -- check against pure-JAX reference.
    y = feed_forward_block(x, w1, b1, w2, b2, dropout_rate=0.0, tk=128)
    y = jax.block_until_ready(y)
    assert y.shape == (B, S, d_model)
    assert jnp.allclose(y, ref, rtol=1e-4, atol=1e-4)

    # 2) train-mode dropout path (deterministic hash-based mask).
    y_do = feed_forward_block(x, w1, b1, w2, b2, dropout_rate=0.1, seed=1234, tk=128)
    y_do = jax.block_until_ready(y_do)
    assert y_do.shape == (B, S, d_model)
    assert bool(jnp.all(jnp.isfinite(y_do)))

    # 3) bf16 MXU compute path (the v6e/v7x production configuration).
    y_bf = feed_forward_block(x, w1, b1, w2, b2, dropout_rate=0.0,
                              compute_dtype=jnp.bfloat16)
    y_bf = jax.block_until_ready(y_bf)
    assert jnp.allclose(y_bf.astype(jnp.float32), ref, rtol=3e-2, atol=3e-2)

    print("KERNEL_OK")
</pallas_src>

<mosaic_0001>
module attributes {stable_mosaic.version = 11 : i64} {
  func.func @_ffn_kernel(%arg0: i32, %arg1: i32, %arg2: memref<16x128xf32, #tpu.memory_space<vmem>>, %arg3: memref<128x128xf32, #tpu.memory_space<vmem>>, %arg4: memref<1x128xf32, #tpu.memory_space<vmem>>, %arg5: memref<128x128xf32, #tpu.memory_space<vmem>>, %arg6: memref<1x128xf32, #tpu.memory_space<vmem>>, %arg7: memref<16x128xf32, #tpu.memory_space<vmem>>, %arg8: memref<16x128xf32, #tpu.memory_space<vmem>>) attributes {dimension_semantics = [#tpu.dimension_semantics<parallel>, #tpu.dimension_semantics<arbitrary>], iteration_bounds = array<i64: 1, 3>, scalar_prefetch = 0 : i64, scratch_operands = 1 : i64, tpu.core_type = #tpu.core_type<tc>, window_params = [{transform_indices = @transform_0, window_bounds = array<i64: 16, 128>}, {transform_indices = @transform_1, window_bounds = array<i64: 128, 128>}, {transform_indices = @transform_2, window_bounds = array<i64: 1, 128>}, {transform_indices = @transform_3, window_bounds = array<i64: 128, 128>}, {pipeline_mode = #tpu.pipeline_mode<synchronous>, transform_indices = @transform_4, window_bounds = array<i64: 1, 128>}, {transform_indices = @transform_5, window_bounds = array<i64: 16, 128>}]} {
    %c0_i32 = arith.constant 0 : i32
    %0 = arith.cmpi eq, %arg1, %c0_i32 : i32
    %1 = arith.extui %0 : i1 to i32
    %c0_i32_0 = arith.constant 0 : i32
    %2 = arith.cmpi ne, %1, %c0_i32_0 : i32
    scf.if %2 {
      %cst_15 = arith.constant 0.000000e+00 : f32
      %19 = vector.broadcast %cst_15 : f32 to vector<16x128xf32>
      %c0_16 = arith.constant 0 : index
      %c0_17 = arith.constant 0 : index
      %20 = vector.load %arg8[%c0_16, %c0_17] : memref<16x128xf32, #tpu.memory_space<vmem>>, vector<16x128xf32>
      tpu.vector_store %arg8[%c0_16, %c0_17], %19 {strides = array<i32>} : memref<16x128xf32, #tpu.memory_space<vmem>>, vector<16x128xf32>,
    } else {
    }
    %c0 = arith.constant 0 : index
    %c0_1 = arith.constant 0 : index
    %3 = vector.load %arg2[%c0, %c0_1] : memref<16x128xf32, #tpu.memory_space<vmem>>, vector<16x128xf32>
    %c0_2 = arith.constant 0 : index
    %c0_3 = arith.constant 0 : index
    %4 = vector.load %arg3[%c0_2, %c0_3] : memref<128x128xf32, #tpu.memory_space<vmem>>, vector<128x128xf32>
    %cst = arith.constant dense<0.000000e+00> : vector<16x128xf32>
    %5 = tpu.matmul %3, %4, %cst {dimension_numbers = #tpu.dot_dimension_numbers<[1], [0], [0], [1], [0, 0, 1, 1], [], []>} : vector<16x128xf32>, vector<128x128xf32>, vector<16x128xf32> -> vector<16x128xf32>
    %c0_4 = arith.constant 0 : index
    %c0_5 = arith.constant 0 : index
    %6 = vector.load %arg4[%c0_4, %c0_5] : memref<1x128xf32, #tpu.memory_space<vmem>>, vector<1x128xf32>
    %7 = vector.broadcast %6 : vector<1x128xf32> to vector<16x128xf32>
    %8 = arith.addf %5, %7 : vector<16x128xf32>
    %cst_6 = arith.constant 0.000000e+00 : f32
    %9 = vector.broadcast %cst_6 : f32 to vector<16x128xf32>
    %10 = arith.maximumf %8, %9 : vector<16x128xf32>
    %c0_7 = arith.constant 0 : index
    %c0_8 = arith.constant 0 : index
    %11 = vector.load %arg8[%c0_7, %c0_8] : memref<16x128xf32, #tpu.memory_space<vmem>>, vector<16x128xf32>
    %c0_9 = arith.constant 0 : index
    %c0_10 = arith.constant 0 : index
    %12 = vector.load %arg5[%c0_9, %c0_10] : memref<128x128xf32, #tpu.memory_space<vmem>>, vector<128x128xf32>
    %cst_11 = arith.constant dense<0.000000e+00> : vector<16x128xf32>
    %13 = tpu.matmul %10, %12, %cst_11 {dimension_numbers = #tpu.dot_dimension_numbers<[1], [0], [0], [1], [0, 0, 1, 1], [], []>} : vector<16x128xf32>, vector<128x128xf32>, vector<16x128xf32> -> vector<16x128xf32>
    %14 = arith.addf %11, %13 : vector<16x128xf32>
    %c0_12 = arith.constant 0 : index
    %c0_13 = arith.constant 0 : index
    %15 = vector.load %arg8[%c0_12, %c0_13] : memref<16x128xf32, #tpu.memory_space<vmem>>, vector<16x128xf32>
    tpu.vector_store %arg8[%c0_12, %c0_13], %14 {strides = array<i32>} : memref<16x128xf32, #tpu.memory_space<vmem>>, vector<16x128xf32>,
    %c2_i32 = arith.constant 2 : i32
    %16 = arith.cmpi eq, %arg1, %c2_i32 : i32
    %17 = arith.extui %16 : i1 to i32
    %c0_i32_14 = arith.constant 0 : i32
    %18 = arith.cmpi ne, %17, %c0_i32_14 : i32
    scf.if %18 {
      %c0_15 = arith.constant 0 : index
      %c0_16 = arith.constant 0 : index
      %19 = vector.load %arg8[%c0_15, %c0_16] : memref<16x128xf32, #tpu.memory_space<vmem>>, vector<16x128xf32>
      %c0_17 = arith.constant 0 : index
      %c0_18 = arith.constant 0 : index
      %20 = vector.load %arg6[%c0_17, %c0_18] : memref<1x128xf32, #tpu.memory_space<vmem>>, vector<1x128xf32>
      %21 = vector.broadcast %20 : vector<1x128xf32> to vector<16x128xf32>
      %22 = arith.addf %19, %21 : vector<16x128xf32>
      %c0_19 = arith.constant 0 : index
      %c0_20 = arith.constant 0 : index
      %23 = vector.load %arg7[%c0_19, %c0_20] : memref<16x128xf32, #tpu.memory_space<vmem>>, vector<16x128xf32>
      tpu.vector_store %arg7[%c0_19, %c0_20], %22 {strides = array<i32>} : memref<16x128xf32, #tpu.memory_space<vmem>>, vector<16x128xf32>,
    } else {
    }
    return
  }
  func.func @transform_0(%arg0: i32, %arg1: i32) -> (i32, i32) {
    %c0_i32 = arith.constant 0 : i32
    %c0_i32_0 = arith.constant 0 : i32
    return %arg0, %c0_i32 : i32, i32
  }
  func.func @transform_1(%arg0: i32, %arg1: i32) -> (i32, i32) {
    %c0_i32 = arith.constant 0 : i32
    %c0_i32_0 = arith.constant 0 : i32
    return %c0_i32, %arg1 : i32, i32
  }
  func.func @transform_2(%arg0: i32, %arg1: i32) -> (i32, i32) {
    %c0_i32 = arith.constant 0 : i32
    %c0_i32_0 = arith.constant 0 : i32
    return %c0_i32, %arg1 : i32, i32
  }
  func.func @transform_3(%arg0: i32, %arg1: i32) -> (i32, i32) {
    %c0_i32 = arith.constant 0 : i32
    %c0_i32_0 = arith.constant 0 : i32
    return %arg1, %c0_i32 : i32, i32
  }
  func.func @transform_4(%arg0: i32, %arg1: i32) -> (i32, i32) {
    %c0_i32 = arith.constant 0 : i32
    %c0_i32_0 = arith.constant 0 : i32
    %c0_i32_1 = arith.constant 0 : i32
    return %c0_i32, %c0_i32_0 : i32, i32
  }
  func.func @transform_5(%arg0: i32, %arg1: i32) -> (i32, i32) {
    %c0_i32 = arith.constant 0 : i32
    %c0_i32_0 = arith.constant 0 : i32
    return %arg0, %c0_i32 : i32, i32
  }
}

</mosaic_0001>

<bundles_post_ra>
// kernel: tpu_custom_call.1
= control target key start
LH: loop header
LB: loop body
LE: loop exit
PB: predicated region body
PF: predicated region fallthrough
CT: control target
= control target key end

     0   :  { %10 = vsyncpa [#allocation4], 0  ;;  %s1443_s0 = inlined_call_operand.hbm [shape: f32[16,128], index: 0, kind: input, shape index: {}]   ;;  %s1444_s1 = inlined_call_operand.hbm [shape: f32[128,384], index: 1, kind: input, shape index: {}]   ;;  %s1445_s2 = inlined_call_operand.vmem [shape: f32[1,384], index: 2, kind: input, shape index: {}]   ;;  %s1446_s3 = inlined_call_operand.hbm [shape: f32[384,128], index: 3, kind: input, shape index: {}]   ;;  %s1447_s4 = inlined_call_operand.vmem [shape: f32[1,128], index: 4, kind: input, shape index: {}]   ;;  %s1448_s5 = inlined_call_operand.hbm [shape: f32[16,128], index: 5, kind: output, shape index: {}]  }
   0x1   :  { %11 = vsyncpa [#allocation7], 0 }
   0x2   :  { %13 = vsyncpa [#allocation7 + $0x1], 0 }
   0x3   :  { %14 = vsyncpa [#allocation5], 0  ;;  %s1152_s18 = smov 0   ;;  %s1154_s19 = smov 0  }
   0x4   :  { %s1156_s20 = smov 0   ;;  %s1158_s21 = smov 0  }
   0x5   :  { %s1160_s22 = smov 0   ;;  %s1162_s23 = smov 0  }
   0x6 LB: > { %s29_s24 = sadd.s32 1, %s1106_s22  ;;  %s65_s25 = sadd.s32 1, %s1098_s20  ;;  %s1110_s23 = sphi %s1162_s23, %s20_s23   ;;  %s1106_s22 = sphi %s1160_s22, %s1465_s22   ;;  %s1102_s21 = sphi %s1158_s21, %s1464_s21   ;;  %s1098_s20 = sphi %s1156_s20, %s1463_s20   ;;  %s1094_s19 = sphi %s1154_s19, %s1462_s19   ;;  %s1090_s18 = sphi %s1152_s18, %s1461_s18  }
   0x7   : > { %p30_p0 = scmp.ge.s32.totalorder %s29_s24, 3  ;;  %p72_p1 = scmp.ne.s32.totalorder %s1098_s20, %s1094_s19 }
   0x8   : > { %p73_p2 = scmp.eq.s32.totalorder %s1110_s23, 0  ;;  %p878_p5 = scmp.lt.s32.totalorder %s1110_s23, 3 }
   0x9   : > { %s1467_s24 = smov (%p30_p0, %s29_s24), 0  ;;  %s220_s28 = sand.u32 1, %s1110_s23  }
   0xa   : > { %p1189_p3 = por %p73_p2, %p72_p1  ;;  %s62_s27 = ssub.s32 %s1106_s22, %s1467_s24 }
   0xb   : > { %p63_p4 = scmp.eq.s32.totalorder %s62_s27, 0  ;;  %s222_s29 = sand.u32 1, %s1098_s20  }
   0xc   : > { %s1201_s6 = sshll.u32 %s222_s29, 7  ;;  %s667_s7 = sshll.u32 %s1106_s22, 7 }
   0xd   : > { %s1199_s30 = scalar_select %p63_p4, %s1098_s20, %s65_s25  }
   0xe   : > { %s1207_s10 = scalar_lea.hbm %s1444_s1, %s667_s7  ;;  %s224_s11 = scalar_lea.vmem [#allocation6], %s1201_s6 }
   0xf   : > { %s230_s12 = sshll.u32 %s224_s11, 4  ;;  %p1214_p6 = pnand %p878_p5, %p1189_p3  ;;  %s1210_s12 = int_to_ptr.vmem [resolvable:$true] %s230_s12 }
  0x10   : > { %s1218_s14 = scalar_lea.sflag [#allocation7], %s220_s28  ;;  %s938_s15 = scalar_lea.hbm %s1207_s10, 2048 }
  0x11   : > { %p939_p7 = scmp.ne.s32.totalorder %s1207_s10, %s938_s15  ;;  %p940_p8 = pneg %p1214_p6 }
  0x12   : > { %s943_s25 = scalar_lea.hbm %s1444_s1, 6144  ;;  %p944_p11 = scmp.lt.u32.totalorder %s1207_s10, %s1444_s1 }
  0x13   : > { %p941_p9 = pnand %p940_p8, %p939_p7  ;;  %p945_p12 = scmp.lt.u32.totalorder %s943_s25, %s938_s15 }
  0x14   : > { %p947_p0 = scmp.lt.u32.totalorder %s938_s15, %s1207_s10 }
  0x15   : > { %p942_p10 = pneg %p941_p9  ;;  %p946_p13 = por %p945_p12, %p944_p11 }
  0x17   : > { %p948_p1 = por %p947_p0, %p946_p13 }
  0x19   : > { %p949_p2 = pnand %p948_p1, %p942_p10 }
  0x1b   : > { %952 = shalt.err (!%p949_p2)
}
  0x1c   : > { %s953_s28 = scalar_lea.vmem %s1210_s12, 2048  ;;  %s1112_s29 = smov [#allocation6]  }
  0x1d   : > { %p954_p3 = scmp.ne.s32.totalorder %s1210_s12, %s953_s28  ;;  %s958_s7 = sshll.u32 %s1112_s29, 4  ;;  %s959_s7 = int_to_ptr.vmem [resolvable:$false] %s958_s7 }
  0x1e   : > { %s960_s8 = scalar_lea.vmem %s959_s7, 4096  ;;  %p961_p7 = scmp.lt.s32.totalorder %s1210_s12, %s959_s7 }
  0x1f   : > { %p956_p4 = pnand %p954_p3, %p940_p8  ;;  %p962_p9 = scmp.lt.s32.totalorder %s960_s8, %s953_s28 }
  0x21   : > { %p957_p5 = pneg %p956_p4  ;;  %p963_p11 = por %p962_p9, %p961_p7 }
  0x23   : > { %p964_p12 = pnand %p963_p11, %p957_p5 }
  0x25   : > { %967 = shalt.err (!%p964_p12)
}
  0x26   : > { %s1113_s9 = smov 384   ;;  %s1114_s11 = smov 128  }
  0x27   : > { %s1115_s15 = smov 8   ;;  %s1249_s16 = sadd.s32 4294967295, %s1110_s23  }
  0x28   : > { %873 = dma.hbm_to_vmem [thread:$0]  (!%p1214_p6), %s1207_s10, 2048, %s1210_s12, %s1218_s14, %s1113_s9, %s1114_s11, %s1115_s15  }
  0x29   : > { %p78_p10 = scmp.ne.s32.totalorder %s1094_s19, %s1090_s18  ;;  %p1449_p13 = scmp.eq.s32.totalorder %s1249_s16, 0 }
  0x2a   : > { %p663_p0 = scmp.ge.s32.totalorder %s1110_s23, 1  ;;  %p188_p1 = scmp.lt.s32.totalorder %s1110_s23, 4 }
  0x2b   : > { %p1258_p2 = por %p1449_p13, %p78_p10  ;;  %s1116_s10 = smov [#allocation3]  }
  0x2c   : > { %p1262_p3 = pnand %p663_p0, %p188_p1  ;;  %s203_s12 = sshll.u32 %s1116_s10, 4  ;;  %s1266_s12 = int_to_ptr.vmem [resolvable:$true] %s203_s12 }
  0x2d   : > { %s1454_s17 = scalar_select %p1258_p2, 1, 0 }
  0x2e   : > { %s1455_s25 = scalar_select %p1262_p3, 1, 0 }
  0x2f   : > { %p866_p4 = pneg %p1262_p3  ;;  %s683_s18 = sshll.u32 %s1106_s22, 11 }
  0x30   : > { %s1274_s28 = scalar_lea.hbm %s1446_s3, %s683_s18  ;;  %s250_s29 = scalar_lea.vmem [#allocation8], %s1201_s6 }
  0x31   : > { %s257_s7 = sshll.u32 %s250_s29, 4  ;;  %p1279_p5 = pnand %p866_p4, %p1449_p13  ;;  %s1283_s7 = int_to_ptr.vmem [resolvable:$true] %s257_s7 }
  0x32   : > { %s968_s9 = scalar_lea.hbm %s1274_s28, 2048  ;;  %s973_s26 = scalar_lea.hbm %s1446_s3, 6144 }
  0x33   : > { %p969_p7 = scmp.ne.s32.totalorder %s1274_s28, %s968_s9  ;;  %p974_p12 = scmp.lt.u32.totalorder %s1274_s28, %s1446_s3 }
  0x34   : > { %p975_p10 = scmp.lt.u32.totalorder %s973_s26, %s968_s9  ;;  %p977_p1 = scmp.lt.u32.totalorder %s968_s9, %s1274_s28 }
  0x35   : > { %p971_p9 = pnand %p969_p7, %p940_p8 }
  0x36   : > { %p976_p0 = por %p975_p10, %p974_p12 }
  0x37   : > { %p972_p11 = pneg %p971_p9 }
  0x38   : > { %p978_p4 = por %p977_p1, %p976_p0 }
  0x3a   : > { %p979_p13 = pnand %p978_p4, %p972_p11 }
  0x3c   : > { %982 = shalt.err (!%p979_p13)
}
  0x3d   : > { %s983_s29 = scalar_lea.vmem %s1283_s7, 2048  ;;  %s1117_s10 = smov [#allocation8]  }
  0x3e   : > { %p984_p7 = scmp.ne.s32.totalorder %s1283_s7, %s983_s29  ;;  %s988_s18 = sshll.u32 %s1117_s10, 4  ;;  %s989_s18 = int_to_ptr.vmem [resolvable:$false] %s988_s18 }
  0x3f   : > { %s990_s27 = scalar_lea.vmem %s989_s18, 4096  ;;  %p991_p3 = scmp.lt.s32.totalorder %s1283_s7, %s989_s18 }
  0x40   : > { %p986_p9 = pnand %p984_p7, %p940_p8  ;;  %p992_p12 = scmp.lt.s32.totalorder %s990_s27, %s983_s29 }
  0x42   : > { %p987_p2 = pneg %p986_p9  ;;  %p993_p10 = por %p992_p12, %p991_p3 }
  0x44   : > { %p994_p0 = pnand %p993_p10, %p987_p2 }
  0x46   : > { %997 = shalt.err (!%p994_p0)
}
  0x47   : > { %876 = dma.hbm_to_vmem [thread:$0]  (!%p1214_p6), %s1274_s28, 2048, %s1283_s7, %s1218_s14, %s1114_s11, %s1114_s11, %s1115_s15  }
  0x48   : > { %s998_s6 = scalar_lea.hbm %s1443_s0, 256  ;;  %p1000_p13 = pneg %p1279_p5 }
  0x49   : > { %p999_p8 = scmp.ne.s32.totalorder %s1443_s0, %s998_s6  ;;  %p1005_p11 = scmp.lt.u32.totalorder %s998_s6, %s1443_s0 }
  0x4b   : > { %p1001_p2 = pnand %p1000_p13, %p999_p8 }
  0x4d   : > { %p1002_p3 = pneg %p1001_p2 }
  0x4f   : > { %p1007_p1 = pnand %p1005_p11, %p1002_p3 }
  0x51   : > { %1010 = shalt.err (!%p1007_p1)
}
  0x52   : > { %s1011_s14 = scalar_lea.vmem %s1266_s12, 256  ;;  %p1019_p9 = scmp.lt.s32.totalorder %s1266_s12, %s1266_s12 }
  0x53   : > { %p1012_p6 = scmp.ne.s32.totalorder %s1266_s12, %s1011_s14  ;;  %p1020_p12 = scmp.lt.s32.totalorder %s1011_s14, %s1011_s14 }
  0x55   : > { %p1014_p4 = pnand %p1012_p6, %p1000_p13  ;;  %p1021_p10 = por %p1020_p12, %p1019_p9 }
  0x57   : > { %p1015_p7 = pneg %p1014_p4 }
  0x59   : > { %p1022_p0 = pnand %p1021_p10, %p1015_p7 }
  0x5b   : > { %1025 = shalt.err (!%p1022_p0)
}
  0x5c   : > { %869 = dma.hbm_to_vmem [thread:$0]  (!%p1279_p5), %s1443_s0, 256, %s1266_s12, [#allocation4], %s1114_s11, %s1114_s11, %s1115_s15  }
  0x5d   : > { %p1457_p8 = scmp.ne.s32.totalorder %s1455_s25, 0 }
  0x5e   : > { %p1458_p13 = scmp.eq.s32.totalorder (!%p1457_p8), %s1249_s16, 0 }
  0x5f   : > { %269 = sbr.rel (%p1457_p8) target bundleno = 623 (0x26f), region = 40 }
  0x66   : > { %1077 = dma.done.wait (%p1458_p13), [#allocation4], 256   ;;  %p1459_p2 = pmov %p1458_p13 }
  0x67   : > { %s275_s8 = sand.u32 1, %s1249_s16   ;;  %s277_s27 = sand.u32 1, %s1094_s19  }
  0x68   : > { %1079 = vsyncadd (%p1459_p2), [#allocation4], 4294967040  ;;  %s673_s9 = sshll.u32 %s277_s27, 7  ;;  %s276_s26 = scalar_lea.sflag [#allocation7], %s275_s8 }
  0x69   : > { %s1344_s6 = scalar_lea.vmem [#allocation6], %s673_s9  ;;  %p1460_p3 = scmp.ne.s32.totalorder %s1454_s17, 0 }
  0x6b   : > { %1081 = dma.done.wait (%p1460_p3), %s276_s26, 4096  }
  0x6c   : > { %1083 = vsyncadd (%p1460_p3), %s276_s26, 4294963200  ;;  %p319_p5 = scmp.lt.s32.totalorder %s1102_s21, 2  ;;  %s1358_s10 = scalar_lea.vmem [#allocation8], %s673_s9 }
  0x6d   : > { %p675_p11 = scmp.ne.s32.totalorder %s1102_s21, 0 }
  0x6e   : > { %s1352_s11 = scalar_select %p319_p5, %s1102_s21, 2 }
  0x6f   : > { %327 = sbr.rel (%p675_p11) target bundleno = 118 (0x76), region = 56  ;;  %v1118_v0 = vmov (!%p675_p11), 0.0  }
  0x70   : > { %s321_s12 = scalar_lea.vmem %s1445_s2, %s1352_s11  ;;  %328 = vst [vmem:[#allocation2] sm:$0xff] (!%p675_p11), %v1118_v0  ;;  %329 = vst [vmem:[#allocation2 + $0x8] sm:$0xff] (!%p675_p11), %v1118_v0 }
  0x76 PF: > { %v332_v1 = vld [vmem:[%s1344_s6] sm:$0xff]  ;;  %v333_v2 = vld [vmem:[%s1344_s6 + $0x8] sm:$0xff]  ;;  %v334_v3 = vld [vmem:[%s1344_s6 + $0x10] sm:$0xff]  ;;  %p677_p1 = scmp.ne.s32.totalorder %s1102_s21, 2 }
  0x77   : > { %v790_v4 = vpack.c.bf16 %v333_v2, %v332_v1  ;;  %v335_v5 = vld [vmem:[%s1344_s6 + $0x18] sm:$0xff]  ;;  %v336_v7 = vld [vmem:[%s1344_s6 + $0x20] sm:$0xff]  ;;  %v337_v8 = vld [vmem:[%s1344_s6 + $0x28] sm:$0xff] }
  0x78   : > { %v794_v6 = vpack.c.bf16 %v335_v5, %v334_v3  ;;  %v798_v9 = vpack.c.bf16 %v337_v8, %v336_v7  ;;  %v338_v10 = vld [vmem:[%s1344_s6 + $0x30] sm:$0xff]  ;;  %v339_v11 = vld [vmem:[%s1344_s6 + $0x38] sm:$0xff]  ;;  %v434_v13 = vld [vmem:[%s1358_s10] sm:$0xff] }
  0x79   : > { %791 = vmatprep.subr.bf16.mxu0 %v790_v4  ;;  %v330_v12 = vld [vmem:[#allocation3] sm:$0xff]  ;;  %v435_v14 = vld [vmem:[%s1358_s10 + $0x8] sm:$0xff]  ;;  %v437_v17 = vld [vmem:[%s1358_s10 + $0x18] sm:$0xff]  ;;  %v802_v21 = vpack.c.bf16 %v339_v11, %v338_v10 }
  0x7a   : > { %793 = vmatpush3.bf16.msra.mxu0 %v790_v4  ;;  %752 = vmatprep.mubr.f32.mxu0 %v330_v12  ;;  %v436_v15 = vld [vmem:[%s1358_s10 + $0x10] sm:$0xff]  ;;  %v822_v16 = vpack.c.bf16 %v435_v14, %v434_v13  ;;  %v438_v19 = vld [vmem:[%s1358_s10 + $0x20] sm:$0xff]  ;;  %v439_v20 = vld [vmem:[%s1358_s10 + $0x28] sm:$0xff] }
  0x7b   : > { %795 = vmatprep.subr.bf16.mxu0 %v794_v6  ;;  %v826_v18 = vpack.c.bf16 %v437_v17, %v436_v15  ;;  %v340_v22 = vld [vmem:[%s1344_s6 + $0x40] sm:$0xff]  ;;  %v341_v23 = vld [vmem:[%s1344_s6 + $0x48] sm:$0xff]  ;;  %v830_v24 = vpack.c.bf16 %v439_v20, %v438_v19  ;;  %v440_v25 = vld [vmem:[%s1358_s10 + $0x30] sm:$0xff] }
  0x7c   : > { %823 = vmatprep.subr.bf16.mxu1 %v822_v16  ;;  %v441_v26 = vld [vmem:[%s1358_s10 + $0x38] sm:$0xff]  ;;  %v806_v27 = vpack.c.bf16 %v341_v23, %v340_v22  ;;  %v342_v28 = vld [vmem:[%s1344_s6 + $0x50] sm:$0xff]  ;;  %v442_v31 = vld [vmem:[%s1358_s10 + $0x40] sm:$0xff] }
  0x7d   : > { %825 = vmatpush3.bf16.msra.mxu1 %v822_v16  ;;  %v343_v29 = vld [vmem:[%s1344_s6 + $0x58] sm:$0xff]  ;;  %v834_v30 = vpack.c.bf16 %v441_v26, %v440_v25  ;;  %v443_v32 = vld [vmem:[%s1358_s10 + $0x48] sm:$0xff]  ;;  %v344_v34 = vld [vmem:[%s1344_s6 + $0x60] sm:$0xff] }
  0x7e   : > { %797 = vmatpush3.bf16.msra.mxu0 %v794_v6  ;;  %827 = vmatprep.subr.bf16.mxu1 %v826_v18  ;;  %v810_v33 = vpack.c.bf16 %v343_v29, %v342_v28  ;;  %v345_v35 = vld [vmem:[%s1344_s6 + $0x68] sm:$0xff]  ;;  %v838_v36 = vpack.c.bf16 %v443_v32, %v442_v31  ;;  %v444_v37 = vld [vmem:[%s1358_s10 + $0x50] sm:$0xff]  ;;  %v445_v38 = vld [vmem:[%s1358_s10 + $0x58] sm:$0xff] }
  0x7f   : > { %799 = vmatprep.subr.bf16.mxu0 %v798_v9  ;;  %v814_v39 = vpack.c.bf16 %v345_v35, %v344_v34  ;;  %v346_v40 = vld [vmem:[%s1344_s6 + $0x70] sm:$0xff]  ;;  %v347_v41 = vld [vmem:[%s1344_s6 + $0x78] sm:$0xff]  ;;  %v842_v42 = vpack.c.bf16 %v445_v38, %v444_v37  ;;  %v446_v43 = vld [vmem:[%s1358_s10 + $0x60] sm:$0xff] }
  0x80   : > { %v447_v44 = vld [vmem:[%s1358_s10 + $0x68] sm:$0xff]  ;;  %v818_v45 = vpack.c.bf16 %v347_v41, %v346_v40  ;;  %v331_v47 = vld [vmem:[#allocation3 + $0x8] sm:$0xff]  ;;  %v448_v48 = vld [vmem:[%s1358_s10 + $0x70] sm:$0xff] }
  0x81   : > { %829 = vmatpush3.bf16.msra.mxu1 %v826_v18  ;;  %v846_v46 = vpack.c.bf16 %v447_v44, %v446_v43  ;;  %v449_v49 = vld [vmem:[%s1358_s10 + $0x78] sm:$0xff]  ;;  %v676_v51 = vld [vmem:[%s321_s12] ss:$0 sm:$0xff]  ;;  %v433_v58 = vld [vmem:[#allocation2 + $0x8] sm:$0xff] }
  0x82   : > { %801 = vmatpush3.bf16.msra.mxu0 %v798_v9  ;;  %831 = vmatprep.subr.bf16.mxu1 %v830_v24  ;;  %v850_v50 = vpack.c.bf16 %v449_v49, %v448_v48  ;;  %v432_v59 = vld [vmem:[#allocation2] sm:$0xff] }
  0x83   : > { %803 = vmatprep.subr.bf16.mxu0 %v802_v21  ;;  %v678_v1 = vld [vmem:[%s1447_s4] ss:$0 sm:$0xff] (!%p677_p1) }
  0x85   : > { %833 = vmatpush3.bf16.msra.mxu1 %v830_v24 }
  0x86   : > { %805 = vmatpush3.bf16.msra.mxu0 %v802_v21  ;;  %835 = vmatprep.subr.bf16.mxu1 %v834_v30 }
  0x87   : > { %807 = vmatprep.subr.bf16.mxu0 %v806_v27 }
  0x89   : > { %837 = vmatpush3.bf16.msra.mxu1 %v834_v30 }
  0x8a   : > { %809 = vmatpush3.bf16.msra.mxu0 %v806_v27  ;;  %839 = vmatprep.subr.bf16.mxu1 %v838_v36 }
  0x8b   : > { %811 = vmatprep.subr.bf16.mxu0 %v810_v33 }
  0x8d   : > { %841 = vmatpush3.bf16.msra.mxu1 %v838_v36 }
  0x8e   : > { %813 = vmatpush3.bf16.msra.mxu0 %v810_v33  ;;  %843 = vmatprep.subr.bf16.mxu1 %v842_v42 }
  0x8f   : > { %815 = vmatprep.subr.bf16.mxu0 %v814_v39 }
  0x91   : > { %845 = vmatpush3.bf16.msra.mxu1 %v842_v42 }
  0x92   : > { %817 = vmatpush3.bf16.msra.mxu0 %v814_v39  ;;  %847 = vmatprep.subr.bf16.mxu1 %v846_v46 }
  0x93   : > { %819 = vmatprep.subr.bf16.mxu0 %v818_v45 }
  0x95   : > { %849 = vmatpush3.bf16.msra.mxu1 %v846_v46 }
  0x96   : > { %821 = vmatpush3.bf16.msra.mxu0 %v818_v45  ;;  %851 = vmatprep.subr.bf16.mxu1 %v850_v50 }
  0x99   : > { %753 = vmatmul.mubr.f32.vlgmr.msra.gmra.mrb[0].mxu0 %v331_v47  ;;  %853 = vmatpush3.bf16.msra.mxu1 %v850_v50 }
 0x16c   : > { %v754_v52 = vpop.f32.mrb[0].mxu0 }
 0x16d   : > { %v427_v53 = vadd.f32 %v754_v52, %v676_v51  ;;  %v421_v54 = vpop.f32.mrb[1].mxu0 }
 0x16e   : > { %v422_v55 = vadd.f32 %v676_v51, %v421_v54 }
 0x16f   : > { %v431_v57 = vmax.f32 %v427_v53, 0.0 }
 0x170   : > { %v430_v56 = vmax.f32 %v422_v55, 0.0 }
 0x172   : > { %787 = vmatprep.mubr.f32.mxu1 %v430_v56 }
 0x173   : > { %788 = vmatmul.mubr.f32.vlgmr.msra.gmra.mrb[0].mxu1 %v431_v57 }
 0x244   : > { %532 = sbr.rel (%p677_p1) target bundleno = 597 (0x255), region = 60 }
 0x246   : > { %v789_v60 = vpop.f32.mrb[0].mxu1 }
 0x247   : > { %v526_v61 = vadd.f32 %v789_v60, %v433_v58  ;;  %v516_v62 = vpop.f32.mrb[1].mxu1 }
 0x248   : > { %v525_v63 = vadd.f32 %v516_v62, %v432_v59 }
 0x249   : > { %528 = vst [vmem:[#allocation2 + $0x8] sm:$0xff] %v526_v61 }
 0x24a   : > { %527 = vst [vmem:[#allocation2] sm:$0xff] %v525_v63 }
 0x250   : > { %v534_v2 = vld [vmem:[#allocation2 + $0x8] sm:$0xff] }
 0x251   : > { %v533_v0 = vld [vmem:[#allocation2] sm:$0xff]  ;;  %v543_v4 = vadd.f32 %v678_v1, %v534_v2 }
 0x252   : > { %v542_v3 = vadd.f32 %v678_v1, %v533_v0 }
 0x253   : > { %545 = vst [vmem:[#allocation9 + $0x8] sm:$0xff] %v543_v4 }
 0x254   : > { %544 = vst [vmem:[#allocation9] sm:$0xff] %v542_v3 }
 0x255 PF: > { %p880_p6 = scmp.eq.s32.totalorder %s1249_s16, 2  ;;  %s1119_s14 = smov [#allocation9]  }
 0x256   : > { %s555_s28 = sshll.u32 %s1119_s14, 4  ;;  %s556_s28 = int_to_ptr.vmem [resolvable:$true] %s555_s28 }
 0x257   : > { %s1026_s7 = scalar_lea.vmem %s556_s28, 256  ;;  %p1033_p12 = scmp.lt.s32.totalorder %s556_s28, %s556_s28 }
 0x258   : > { %p1027_p4 = scmp.ne.s32.totalorder %s556_s28, %s1026_s7  ;;  %p1034_p10 = scmp.lt.s32.totalorder %s1026_s7, %s1026_s7 }
 0x25a   : > { %p1028_p7 = pnand %p1027_p4, %p880_p6  ;;  %p1035_p0 = por %p1034_p10, %p1033_p12 }
 0x25c   : > { %p1029_p9 = pneg %p1028_p7 }
 0x25e   : > { %p1036_p8 = pnand %p1035_p0, %p1029_p9 }
 0x260   : > { %1039 = shalt.err (!%p1036_p8)
}
 0x261   : > { %s1040_s27 = scalar_lea.hbm %s1448_s5, 256 }
 0x262   : > { %p1041_p13 = scmp.ne.s32.totalorder %s1448_s5, %s1040_s27  ;;  %p1046_p5 = scmp.lt.u32.totalorder %s1040_s27, %s1448_s5 }
 0x264   : > { %p1042_p2 = pnand %p1041_p13, %p880_p6 }
 0x266   : > { %p1043_p3 = pneg %p1042_p2 }
 0x268   : > { %p1048_p11 = pnand %p1046_p5, %p1043_p3 }
 0x26a   : > { %1051 = shalt.err (!%p1048_p11)
}
 0x26b   : > { %s1120_s15 = smov 128   ;;  %s1121_s25 = smov 8  }
 0x26c   : > { %863 = dma.vmem_to_hbm [thread:$0]  (%p880_p6), %s556_s28, 256, %s1448_s5, [#allocation5], %s1120_s15, %s1120_s15, %s1121_s25  }
 0x26d   : > { %1085 = dma.done.wait (%p880_p6), [#allocation5], 256  }
 0x26e   : > { %1087 = vsyncadd (%p880_p6), [#allocation5], 4294967040 }
 0x26f PF: > { %s20_s23 = sadd.s32 1, %s1110_s23   ;;  %s1461_s18 = smov %s1094_s19 }
 0x270   : > { %p17_p1 = scmp.ge.s32.totalorder %s20_s23, 5   ;;  %s1462_s19 = smov %s1098_s20 }
 0x271   : > { %s1463_s20 = smov %s1199_s30  ;;  %s1464_s21 = smov %s1106_s22 }
 0x272   : > { %s1465_s22 = smov %s1467_s24  ;;  %19 = sbr.rel (!%p17_p1) target bundleno = 6 (0x6), region = 106 }
 0x279   :  { %571 = vsyncpa [#allocation4], 1 }
 0x27a   :  { %573 = vsyncpa [#allocation4 + $0x1], 1 }
 0x27b   :  { %574 = vsyncpa [#allocation7], 1 }
 0x27c   :  { %576 = vsyncpa [#allocation7 + $0x1], 1 }
 0x27d   :  { %577 = vsyncpa [#allocation5], 1 }
 0x27e   :  { %579 = vsyncpa [#allocation5 + $0x1], 1 }

</bundles_post_ra>
